<compile_context>
chip_gen: v7x
topology: tpu7x:2x2x1
jax: 0.10.0
libtpu: 0.0.40
codegen_flags: <defaults>
</compile_context>

<pallas_src>
import functools

import jax
import jax.numpy as jnp
from jax.experimental import pallas as pl
from jax.experimental.pallas import tpu as pltpu


def _round_up(x, m):
    return (x + m - 1) // m * m


def _vmem_limit_bytes():
    # Generation-aware VMEM request: leave ~16 MiB headroom for Mosaic scratch +
    # double-buffered streamed params.
    try:
        cap = pltpu.get_tpu_info().vmem_capacity_bytes
    except Exception:
        cap = 64 * 1024 * 1024
    return max(32 * 1024 * 1024, cap - 16 * 1024 * 1024)


# ---------------------------------------------------------------------------
# Fused Pallas kernel: all GIN layers, h resident in the output block across layers
# ---------------------------------------------------------------------------
def fused_gin_kernel(eps_ref,                         # SMEM [L]  (1 + eps) per layer
                     h0_ref,                          # VMEM [N,D]      f32 (whole array)
                     g_ref, s_ref,                    # VMEM [E,N] [N,E] bf16 (whole array)
                     eemb_ref,                        # VMEM [E,D] bf16  (this layer)
                     w1_ref, b1_ref, w2_ref, b2_ref,  # VMEM per-layer MLP params
                     out_ref):                        # VMEM [N,D] f32, resident h
    layer = pl.program_id(0)
    last = pl.num_programs(0) - 1

    @pl.when(layer == 0)
    def _():                                          # h_list[0] = AtomEncoder(x)
        out_ref[...] = h0_ref[...]

    h = out_ref[...]                                  # f32, resident across layers
    # gather x_j = h[src] via one-hot matmul (MXU); bf16 operands, f32 accumulation
    x_src = jnp.dot(g_ref[...], h.astype(jnp.bfloat16),
                    preferred_element_type=jnp.float32)                   # (E, D) f32
    # message: relu(x_j + edge_embedding)
    msg = jnp.maximum(x_src + eemb_ref[...].astype(jnp.float32), 0.0)     # (E, D) f32
    # aggregate (add) to target nodes via one-hot scatter matmul
    agg = jnp.dot(s_ref[...], msg.astype(jnp.bfloat16),
                  preferred_element_type=jnp.float32)                     # (N, D) f32
    # (1 + eps) * x + aggregated messages   (eps scalar read from SMEM)
    pre = eps_ref[layer] * h + agg
    # GIN MLP: Linear(D, 2D) -> ReLU -> Linear(2D, D)
    h1 = jnp.maximum(
        jnp.dot(pre.astype(jnp.bfloat16), w1_ref[...],
                preferred_element_type=jnp.float32) + b1_ref[...], 0.0)
    h2 = jnp.dot(h1.astype(jnp.bfloat16), w2_ref[...],
                 preferred_element_type=jnp.float32) + b2_ref[...]

    # GNN_node applies ReLU between layers (not on the last one); dropout = identity.
    @pl.when(layer != last)
    def _():
        out_ref[...] = jnp.maximum(h2, 0.0)

    @pl.when(layer == last)
    def _():                                          # JK='last' -> pre-ReLU h2
        out_ref[...] = h2


def fused_gin_layers(eps1p, h0, gmat, smat, eemb, w1, b1, w2, b2):
    L, E_pad, D_pad = eemb.shape
    N_pad = h0.shape[0]
    H_pad = w1.shape[-1]

    def whole_vmem():
        # Grid-invariant operand: whole array resident in VMEM, single-buffered.
        return pl.BlockSpec(memory_space=pltpu.MemorySpace.VMEM)

    def per_layer(shape):
        return pl.BlockSpec((None,) + shape, lambda l: (l,) + (0,) * len(shape))

    return pl.pallas_call(
        fused_gin_kernel,
        out_shape=jax.ShapeDtypeStruct((N_pad, D_pad), jnp.float32),
        grid_spec=pltpu.PrefetchScalarGridSpec(
            num_scalar_prefetch=0,
            grid=(L,),
            in_specs=[
                pl.BlockSpec(memory_space=pltpu.MemorySpace.SMEM),        # eps1p [L]
                whole_vmem(),                                             # h0   (f32)
                whole_vmem(),                                             # G    (bf16)
                whole_vmem(),                                             # S    (bf16)
                per_layer((E_pad, D_pad)),                                # edge emb (bf16)
                per_layer((D_pad, H_pad)),                                # W1 (bf16)
                per_layer((1, H_pad)),                                    # b1 (f32)
                per_layer((H_pad, D_pad)),                                # W2 (bf16)
                per_layer((1, D_pad)),                                    # b2 (f32)
            ],
            out_specs=pl.BlockSpec((N_pad, D_pad), lambda l: (0, 0)),     # resident h
        ),
        compiler_params=pltpu.CompilerParams(
            dimension_semantics=("arbitrary",),       # layers are sequentially dependent
            vmem_limit_bytes=_vmem_limit_bytes(),
        ),
    )(eps1p, h0, gmat, smat, eemb, w1, b1, w2, b2)


# ---------------------------------------------------------------------------
# Glue: embedding encoders (single stacked-table gather, summed over features)
# ---------------------------------------------------------------------------
def encode(table, offsets, feats):
    # table: [sum(vocabs), D]; offsets: int32 [F]; feats: int32 [M, F]
    idx = (feats + offsets[None, :]).reshape(-1)
    emb = jnp.take(table, idx, axis=0)
    return emb.reshape(feats.shape[0], feats.shape[1], -1).sum(axis=1)


# ---------------------------------------------------------------------------
# Full GNN_node forward
# ---------------------------------------------------------------------------
@functools.partial(jax.jit, static_argnames=("num_layer",))
def gnn_node_forward(params, x, edge_index, edge_attr, batch, *, num_layer):
    del batch  # unused in the reference forward (JK='last', no pooling here)
    x = x.astype(jnp.int32)
    edge_attr = edge_attr.astype(jnp.int32)

    h0 = encode(params["atom_tab"], params["atom_off"], x)     # AtomEncoder -> h_list[0]
    src, dst = edge_index[0], edge_index[1]
    N, D = h0.shape
    E = src.shape[0]
    H = params["layers"][0]["w1"].shape[1]                     # 2 * emb_dim

    # pad everything to lane/MXU-friendly multiples of 128 (zeros keep math exact)
    N_pad, E_pad = _round_up(N, 128), _round_up(E, 128)
    D_pad, H_pad = _round_up(D, 128), _round_up(H, 128)

    # one-hot gather (x_j = x[src]) and scatter-add (to dst) matrices, built directly in
    # their final padded layout + bf16 dtype via iota comparison (no transpose, no f32
    # intermediates). Padded edge slots carry index -1 and therefore match no node.
    src_pad = jnp.pad(src.astype(jnp.int32), (0, E_pad - E), constant_values=-1)
    dst_pad = jnp.pad(dst.astype(jnp.int32), (0, E_pad - E), constant_values=-1)
    gmat = (jax.lax.broadcasted_iota(jnp.int32, (E_pad, N_pad), 1)
            == src_pad[:, None]).astype(jnp.bfloat16)          # [E_pad, N_pad]
    smat = (jax.lax.broadcasted_iota(jnp.int32, (N_pad, E_pad), 0)
            == dst_pad[None, :]).astype(jnp.bfloat16)          # [N_pad, E_pad]

    h0_p = jnp.pad(h0, ((0, N_pad - N), (0, D_pad - D))).astype(jnp.float32)

    # precompute + stack per-layer BondEncoder embeddings and MLP params
    # (static matmul operands pre-cast to bf16 on the host; biases stay f32)
    layers = params["layers"]
    eemb = jnp.stack([jnp.pad(encode(lp["bond_tab"], lp["bond_off"], edge_attr),
                              ((0, E_pad - E), (0, D_pad - D)))
                      for lp in layers]).astype(jnp.bfloat16)
    w1 = jnp.stack([jnp.pad(lp["w1"], ((0, D_pad - D), (0, H_pad - H)))
                    for lp in layers]).astype(jnp.bfloat16)
    b1 = jnp.stack([jnp.pad(lp["b1"], ((0, 0), (0, H_pad - H))) for lp in layers])
    w2 = jnp.stack([jnp.pad(lp["w2"], ((0, H_pad - H), (0, D_pad - D)))
                    for lp in layers]).astype(jnp.bfloat16)
    b2 = jnp.stack([jnp.pad(lp["b2"], ((0, 0), (0, D_pad - D))) for lp in layers])
    eps1p = (1.0 + jnp.stack([lp["eps"] for lp in layers])).astype(jnp.float32)  # [L]

    out_pad = fused_gin_layers(eps1p, h0_p, gmat, smat, eemb, w1, b1, w2, b2)
    return out_pad[:N, :D]                                     # strip padding; JK='last'


# ---------------------------------------------------------------------------
# Deterministic parameter init
# ---------------------------------------------------------------------------
def _make_encoder_tables(key, vocabs, emb_dim):
    tabs = []
    for v in vocabs:
        key, sub = jax.random.split(key)
        tabs.append(0.1 * jax.random.normal(sub, (v, emb_dim), jnp.float32))
    offs, acc = [], 0
    for v in vocabs:
        offs.append(acc)
        acc += v
    return key, jnp.concatenate(tabs, axis=0), jnp.array(offs, jnp.int32)


def init_params(key, emb_dim, num_layer, node_vocabs, edge_vocabs):
    key, atom_tab, atom_off = _make_encoder_tables(key, node_vocabs, emb_dim)
    params = {"atom_tab": atom_tab, "atom_off": atom_off, "layers": []}

    def nxt():
        nonlocal key
        key, sub = jax.random.split(key)
        return sub

    for _ in range(num_layer):
        key, bond_tab, bond_off = _make_encoder_tables(key, edge_vocabs, emb_dim)
        lp = {
            "bond_tab": bond_tab, "bond_off": bond_off,
            "w1": 0.1 * jax.random.normal(nxt(), (emb_dim, 2 * emb_dim), jnp.float32),
            "b1": 0.1 * jax.random.normal(nxt(), (1, 2 * emb_dim), jnp.float32),
            "w2": 0.1 * jax.random.normal(nxt(), (2 * emb_dim, emb_dim), jnp.float32),
            "b2": 0.1 * jax.random.normal(nxt(), (1, emb_dim), jnp.float32),
            "eps": jnp.zeros((), jnp.float32),                 # nn.Parameter([0])
            # mlp_edge_attr weights omitted: dead code in GINConvEdge.message
        }
        params["layers"].append(lp)
    return params


if __name__ == "__main__":
    key = jax.random.PRNGKey(0)
    k_x, k_ei, k_ea, k_p = jax.random.split(key, 4)

    N = 16          # nodes
    E = 32          # edges
    D = 32          # emb_dim
    NUM_LAYER = 2
    node_vocabs = [8, 8, 8]   # 3 integer node features
    edge_vocabs = [4, 4, 4]   # 3 integer edge features

    x = jax.random.randint(k_x, (N, len(node_vocabs)), 0, node_vocabs[0], jnp.int32)
    edge_index = jax.random.randint(k_ei, (2, E), 0, N, jnp.int32)
    edge_attr = jax.random.randint(k_ea, (E, len(edge_vocabs)), 0, edge_vocabs[0], jnp.int32)
    batch = jnp.zeros((N,), jnp.int32)

    params = init_params(k_p, D, NUM_LAYER, node_vocabs, edge_vocabs)

    out = gnn_node_forward(params, x, edge_index, edge_attr, batch, num_layer=NUM_LAYER)
    jax.block_until_ready(out)
    assert out.shape == (N, D) and out.dtype == jnp.float32
    print("KERNEL_OK")
</pallas_src>

<mosaic_0001>
module attributes {stable_mosaic.version = 11 : i64} {
  func.func @fused_gin_kernel(%arg0: i32, %arg1: memref<2xf32, #tpu.memory_space<smem>>, %arg2: memref<128x128xf32, #tpu.memory_space<vmem>>, %arg3: memref<128x128xbf16, #tpu.memory_space<vmem>>, %arg4: memref<128x128xbf16, #tpu.memory_space<vmem>>, %arg5: memref<1x128x128xbf16, #tpu.memory_space<vmem>>, %arg6: memref<1x128x128xbf16, #tpu.memory_space<vmem>>, %arg7: memref<1x1x128xf32, #tpu.memory_space<vmem>>, %arg8: memref<1x128x128xbf16, #tpu.memory_space<vmem>>, %arg9: memref<1x1x128xf32, #tpu.memory_space<vmem>>, %arg10: memref<128x128xf32, #tpu.memory_space<vmem>>) attributes {dimension_semantics = [#tpu.dimension_semantics<arbitrary>], iteration_bounds = array<i64: 2>, scalar_prefetch = 0 : i64, scratch_operands = 0 : i64, tpu.core_type = #tpu.core_type<tc>, window_params = [{transform_indices = @transform_0, window_bounds = array<i64: 2>}, {pipeline_mode = #tpu.pipeline_mode<synchronous>, transform_indices = @transform_1, window_bounds = array<i64: 128, 128>}, {pipeline_mode = #tpu.pipeline_mode<synchronous>, transform_indices = @transform_2, window_bounds = array<i64: 128, 128>}, {pipeline_mode = #tpu.pipeline_mode<synchronous>, transform_indices = @transform_3, window_bounds = array<i64: 128, 128>}, {transform_indices = @transform_4, window_bounds = array<i64: 1, 128, 128>}, {transform_indices = @transform_5, window_bounds = array<i64: 1, 128, 128>}, {transform_indices = @transform_6, window_bounds = array<i64: 1, 1, 128>}, {transform_indices = @transform_7, window_bounds = array<i64: 1, 128, 128>}, {transform_indices = @transform_8, window_bounds = array<i64: 1, 1, 128>}, {pipeline_mode = #tpu.pipeline_mode<synchronous>, transform_indices = @transform_9, window_bounds = array<i64: 128, 128>}]} {
    %c0_i32 = arith.constant 0 : i32
    %0 = arith.cmpi eq, %arg0, %c0_i32 : i32
    %1 = arith.extui %0 : i1 to i32
    %c0_i32_0 = arith.constant 0 : i32
    %2 = arith.cmpi ne, %1, %c0_i32_0 : i32
    scf.if %2 {
      %c0_29 = arith.constant 0 : index
      %c0_30 = arith.constant 0 : index
      %45 = vector.load %arg2[%c0_29, %c0_30] : memref<128x128xf32, #tpu.memory_space<vmem>>, vector<128x128xf32>
      %c0_31 = arith.constant 0 : index
      %c0_32 = arith.constant 0 : index
      %46 = vector.load %arg10[%c0_31, %c0_32] : memref<128x128xf32, #tpu.memory_space<vmem>>, vector<128x128xf32>
      tpu.vector_store %arg10[%c0_31, %c0_32], %45 {strides = array<i32>} : memref<128x128xf32, #tpu.memory_space<vmem>>, vector<128x128xf32>,
    } else {
    }
    %c0 = arith.constant 0 : index
    %c0_1 = arith.constant 0 : index
    %3 = vector.load %arg10[%c0, %c0_1] : memref<128x128xf32, #tpu.memory_space<vmem>>, vector<128x128xf32>
    %c0_2 = arith.constant 0 : index
    %c0_3 = arith.constant 0 : index
    %4 = vector.load %arg3[%c0_2, %c0_3] : memref<128x128xbf16, #tpu.memory_space<vmem>>, vector<128x128xbf16>
    %5 = arith.truncf %3 : vector<128x128xf32> to vector<128x128xbf16>
    %cst = arith.constant dense<0.000000e+00> : vector<128x128xf32>
    %6 = tpu.matmul %4, %5, %cst {dimension_numbers = #tpu.dot_dimension_numbers<[1], [0], [0], [1], [0, 0, 1, 1], [], []>} : vector<128x128xbf16>, vector<128x128xbf16>, vector<128x128xf32> -> vector<128x128xf32>
    %c0_4 = arith.constant 0 : index
    %c0_5 = arith.constant 0 : index
    %c0_6 = arith.constant 0 : index
    %7 = vector.load %arg5[%c0_4, %c0_5, %c0_6] : memref<1x128x128xbf16, #tpu.memory_space<vmem>>, vector<1x128x128xbf16>
    %8 = vector.shape_cast %7 : vector<1x128x128xbf16> to vector<128x128xbf16>
    %9 = arith.extf %8 : vector<128x128xbf16> to vector<128x128xf32>
    %10 = arith.addf %6, %9 : vector<128x128xf32>
    %cst_7 = arith.constant 0.000000e+00 : f32
    %11 = vector.broadcast %cst_7 : f32 to vector<128x128xf32>
    %12 = arith.maximumf %10, %11 : vector<128x128xf32>
    %c0_8 = arith.constant 0 : index
    %c0_9 = arith.constant 0 : index
    %13 = vector.load %arg4[%c0_8, %c0_9] : memref<128x128xbf16, #tpu.memory_space<vmem>>, vector<128x128xbf16>
    %14 = arith.truncf %12 : vector<128x128xf32> to vector<128x128xbf16>
    %cst_10 = arith.constant dense<0.000000e+00> : vector<128x128xf32>
    %15 = tpu.matmul %13, %14, %cst_10 {dimension_numbers = #tpu.dot_dimension_numbers<[1], [0], [0], [1], [0, 0, 1, 1], [], []>} : vector<128x128xbf16>, vector<128x128xbf16>, vector<128x128xf32> -> vector<128x128xf32>
    %16 = arith.index_cast %arg0 : i32 to index
    %17 = memref.load %arg1[%16] : memref<2xf32, #tpu.memory_space<smem>>
    %18 = vector.broadcast %17 : f32 to vector<128x128xf32>
    %19 = arith.mulf %18, %3 : vector<128x128xf32>
    %20 = arith.addf %19, %15 : vector<128x128xf32>
    %21 = arith.truncf %20 : vector<128x128xf32> to vector<128x128xbf16>
    %c0_11 = arith.constant 0 : index
    %c0_12 = arith.constant 0 : index
    %c0_13 = arith.constant 0 : index
    %22 = vector.load %arg6[%c0_11, %c0_12, %c0_13] : memref<1x128x128xbf16, #tpu.memory_space<vmem>>, vector<1x128x128xbf16>
    %23 = vector.shape_cast %22 : vector<1x128x128xbf16> to vector<128x128xbf16>
    %cst_14 = arith.constant dense<0.000000e+00> : vector<128x128xf32>
    %24 = tpu.matmul %21, %23, %cst_14 {dimension_numbers = #tpu.dot_dimension_numbers<[1], [0], [0], [1], [0, 0, 1, 1], [], []>} : vector<128x128xbf16>, vector<128x128xbf16>, vector<128x128xf32> -> vector<128x128xf32>
    %c0_15 = arith.constant 0 : index
    %c0_16 = arith.constant 0 : index
    %c0_17 = arith.constant 0 : index
    %25 = vector.load %arg7[%c0_15, %c0_16, %c0_17] : memref<1x1x128xf32, #tpu.memory_space<vmem>>, vector<1x1x128xf32>
    %26 = vector.shape_cast %25 : vector<1x1x128xf32> to vector<1x128xf32>
    %27 = vector.broadcast %26 : vector<1x128xf32> to vector<128x128xf32>
    %28 = arith.addf %24, %27 : vector<128x128xf32>
    %cst_18 = arith.constant 0.000000e+00 : f32
    %29 = vector.broadcast %cst_18 : f32 to vector<128x128xf32>
    %30 = arith.maximumf %28, %29 : vector<128x128xf32>
    %31 = arith.truncf %30 : vector<128x128xf32> to vector<128x128xbf16>
    %c0_19 = arith.constant 0 : index
    %c0_20 = arith.constant 0 : index
    %c0_21 = arith.constant 0 : index
    %32 = vector.load %arg8[%c0_19, %c0_20, %c0_21] : memref<1x128x128xbf16, #tpu.memory_space<vmem>>, vector<1x128x128xbf16>
    %33 = vector.shape_cast %32 : vector<1x128x128xbf16> to vector<128x128xbf16>
    %cst_22 = arith.constant dense<0.000000e+00> : vector<128x128xf32>
    %34 = tpu.matmul %31, %33, %cst_22 {dimension_numbers = #tpu.dot_dimension_numbers<[1], [0], [0], [1], [0, 0, 1, 1], [], []>} : vector<128x128xbf16>, vector<128x128xbf16>, vector<128x128xf32> -> vector<128x128xf32>
    %c0_23 = arith.constant 0 : index
    %c0_24 = arith.constant 0 : index
    %c0_25 = arith.constant 0 : index
    %35 = vector.load %arg9[%c0_23, %c0_24, %c0_25] : memref<1x1x128xf32, #tpu.memory_space<vmem>>, vector<1x1x128xf32>
    %36 = vector.shape_cast %35 : vector<1x1x128xf32> to vector<1x128xf32>
    %37 = vector.broadcast %36 : vector<1x128xf32> to vector<128x128xf32>
    %38 = arith.addf %34, %37 : vector<128x128xf32>
    %c1_i32 = arith.constant 1 : i32
    %39 = arith.cmpi ne, %arg0, %c1_i32 : i32
    %40 = arith.extui %39 : i1 to i32
    %c0_i32_26 = arith.constant 0 : i32
    %41 = arith.cmpi ne, %40, %c0_i32_26 : i32
    scf.if %41 {
      %cst_29 = arith.constant 0.000000e+00 : f32
      %45 = vector.broadcast %cst_29 : f32 to vector<128x128xf32>
      %46 = arith.maximumf %38, %45 : vector<128x128xf32>
      %c0_30 = arith.constant 0 : index
      %c0_31 = arith.constant 0 : index
      %47 = vector.load %arg10[%c0_30, %c0_31] : memref<128x128xf32, #tpu.memory_space<vmem>>, vector<128x128xf32>
      tpu.vector_store %arg10[%c0_30, %c0_31], %46 {strides = array<i32>} : memref<128x128xf32, #tpu.memory_space<vmem>>, vector<128x128xf32>,
    } else {
    }
    %c1_i32_27 = arith.constant 1 : i32
    %42 = arith.cmpi eq, %arg0, %c1_i32_27 : i32
    %43 = arith.extui %42 : i1 to i32
    %c0_i32_28 = arith.constant 0 : i32
    %44 = arith.cmpi ne, %43, %c0_i32_28 : i32
    scf.if %44 {
      %c0_29 = arith.constant 0 : index
      %c0_30 = arith.constant 0 : index
      %45 = vector.load %arg10[%c0_29, %c0_30] : memref<128x128xf32, #tpu.memory_space<vmem>>, vector<128x128xf32>
      tpu.vector_store %arg10[%c0_29, %c0_30], %38 {strides = array<i32>} : memref<128x128xf32, #tpu.memory_space<vmem>>, vector<128x128xf32>,
    } else {
    }
    return
  }
  func.func @transform_0(%arg0: i32) -> i32 {
    %c0_i32 = arith.constant 0 : i32
    %c0_i32_0 = arith.constant 0 : i32
    return %c0_i32 : i32
  }
  func.func @transform_1(%arg0: i32) -> (i32, i32) {
    %c0_i32 = arith.constant 0 : i32
    %c0_i32_0 = arith.constant 0 : i32
    %c0_i32_1 = arith.constant 0 : i32
    return %c0_i32, %c0_i32_0 : i32, i32
  }
  func.func @transform_2(%arg0: i32) -> (i32, i32) {
    %c0_i32 = arith.constant 0 : i32
    %c0_i32_0 = arith.constant 0 : i32
    %c0_i32_1 = arith.constant 0 : i32
    return %c0_i32, %c0_i32_0 : i32, i32
  }
  func.func @transform_3(%arg0: i32) -> (i32, i32) {
    %c0_i32 = arith.constant 0 : i32
    %c0_i32_0 = arith.constant 0 : i32
    %c0_i32_1 = arith.constant 0 : i32
    return %c0_i32, %c0_i32_0 : i32, i32
  }
  func.func @transform_4(%arg0: i32) -> (i32, i32, i32) {
    %c0_i32 = arith.constant 0 : i32
    %c0_i32_0 = arith.constant 0 : i32
    %c0_i32_1 = arith.constant 0 : i32
    return %arg0, %c0_i32, %c0_i32_0 : i32, i32, i32
  }
  func.func @transform_5(%arg0: i32) -> (i32, i32, i32) {
    %c0_i32 = arith.constant 0 : i32
    %c0_i32_0 = arith.constant 0 : i32
    %c0_i32_1 = arith.constant 0 : i32
    return %arg0, %c0_i32, %c0_i32_0 : i32, i32, i32
  }
  func.func @transform_6(%arg0: i32) -> (i32, i32, i32) {
    %c0_i32 = arith.constant 0 : i32
    %c0_i32_0 = arith.constant 0 : i32
    %c0_i32_1 = arith.constant 0 : i32
    return %arg0, %c0_i32, %c0_i32_0 : i32, i32, i32
  }
  func.func @transform_7(%arg0: i32) -> (i32, i32, i32) {
    %c0_i32 = arith.constant 0 : i32
    %c0_i32_0 = arith.constant 0 : i32
    %c0_i32_1 = arith.constant 0 : i32
    return %arg0, %c0_i32, %c0_i32_0 : i32, i32, i32
  }
  func.func @transform_8(%arg0: i32) -> (i32, i32, i32) {
    %c0_i32 = arith.constant 0 : i32
    %c0_i32_0 = arith.constant 0 : i32
    %c0_i32_1 = arith.constant 0 : i32
    return %arg0, %c0_i32, %c0_i32_0 : i32, i32, i32
  }
  func.func @transform_9(%arg0: i32) -> (i32, i32) {
    %c0_i32 = arith.constant 0 : i32
    %c0_i32_0 = arith.constant 0 : i32
    %c0_i32_1 = arith.constant 0 : i32
    return %c0_i32, %c0_i32_0 : i32, i32
  }
}

</mosaic_0001>

<bundles_post_ra>
// kernel: gnn_node_forward.1
= control target key start
LH: loop header
LB: loop body
LE: loop exit
PB: predicated region body
PF: predicated region fallthrough
CT: control target
= control target key end

     0   :  { %14 = vsyncpa [#allocation3], 0  ;;  %s1793_s30 = smov 0   ;;  %s2260_s0 = inlined_call_operand.vmem [shape: f32[2], index: 0, kind: input, shape index: {}]   ;;  %s2261_s1 = inlined_call_operand.vmem [shape: f32[128,128], index: 1, kind: input, shape index: {}]   ;;  %s2262_s2 = inlined_call_operand.vmem [shape: bf16[128,128], index: 2, kind: input, shape index: {}]   ;;  %s2263_s3 = inlined_call_operand.vmem [shape: bf16[128,128], index: 3, kind: input, shape index: {}]   ;;  %s2264_s4 = inlined_call_operand.vmem [shape: bf16[2,128,128], index: 4, kind: input, shape index: {}]   ;;  %s2265_s5 = inlined_call_operand.vmem [shape: bf16[2,128,128], index: 5, kind: input, shape index: {}]   ;;  %s2266_s6 = inlined_call_operand.vmem [shape: f32[2,1,128], index: 6, kind: input, shape index: {}]   ;;  %s2267_s7 = inlined_call_operand.vmem [shape: bf16[2,128,128], index: 7, kind: input, shape index: {}]   ;;  %s2268_s8 = inlined_call_operand.vmem [shape: f32[2,1,128], index: 8, kind: input, shape index: {}]   ;;  %s2269_s9 = inlined_call_operand.vmem [shape: f32[128,128], index: 9, kind: output, shape index: {}]  }
   0x1 LB: > { %s1799_s10 = sadd.s32 4294967295, %s1740_s30   ;;  %p1380_p0 = scmp.ge.s32.totalorder %s1740_s30, 1  ;;  %s1740_s30 = sphi %s1793_s30, %s20_s30  }
   0x2   : > { %p260_p1 = scmp.lt.s32.totalorder %s1740_s30, 3  ;;  %s273_s13 = sshll.u32 %s2260_s0, 4  ;;  %s274_s13 = int_to_ptr.vmem [resolvable:$true] %s273_s13 }
   0x3   : > { %p1672_p4 = scmp.eq.s32.totalorder %s1799_s10, 0  ;;  %s1715_s15 = scalar_lea.vmem %s274_s13, 16 }
   0x4   : > { %p1807_p3 = pnand %p1380_p0, %p260_p1  ;;  %p1716_p7 = scmp.ne.s32.totalorder %s274_s13, %s1715_s15 }
   0x5   : > { %p1723_p11 = scmp.lt.s32.totalorder %s274_s13, %s274_s13  ;;  %p1724_p12 = scmp.lt.s32.totalorder %s1715_s15, %s1715_s15 }
   0x6   : > { %p1668_p5 = pneg %p1807_p3 }
   0x7   : > { %p1725_p13 = por %p1724_p12, %p1723_p11 }
   0x8   : > { %p1669_p6 = pnand %p1672_p4, %p1668_p5 }
   0xa   : > { %p1717_p8 = pneg %p1669_p6 }
   0xc   : > { %p1718_p9 = pnand %p1717_p8, %p1716_p7 }
   0xe   : > { %p1719_p10 = pneg %p1718_p9 }
  0x10   : > { %p1726_p2 = pnand %p1725_p13, %p1719_p10 }
  0x12   : > { %1729 = shalt.err (!%p1726_p2)
}
  0x13   : > { %s1742_s16 = smov [#allocation2]   ;;  %331 = sbr.rel (%p1807_p3) target bundleno = 1023 (0x3ff), region = 56 }
  0x14   : > { %1671 = dma.vmem_to_smem (!%p1669_p6), %s274_s13, 16, %s1742_s16, [#allocation3]  }
  0x1a   : > { %1735 = dma.done.wait (%p1672_p4), [#allocation3], 16  }
  0x1b   : > { %1737 = vsyncadd (%p1672_p4), [#allocation3], 4294967280 }
  0x1c   : > { %337 = sfence }
  0x1d   : > { %p379_p0 = scmp.lt.s32.totalorder %s1799_s10, 1  ;;  %p2271_p1 = scmp.ne.s32.totalorder %s1799_s10, 0 }
  0x1e   : > { %v405_v0 = vld [vmem:[%s2261_s1] sm:$0xff] (!%p2271_p1)  ;;  %v406_v1 = vld [vmem:[%s2261_s1 + $0x8] sm:$0xff] (!%p2271_p1)  ;;  %v407_v2 = vld [vmem:[%s2261_s1 + $0x10] sm:$0xff] (!%p2271_p1) }
  0x1f   : > { %s1824_s17 = scalar_select %p379_p0, %s1799_s10, 1 }
  0x20   : > { %404 = sbr.rel (%p2271_p1) target bundleno = 40 (0x28), region = 64  ;;  %421 = vst [vmem:[%s2269_s9] sm:$0xff] (!%p2271_p1), %v405_v0  ;;  %422 = vst [vmem:[%s2269_s9 + $0x8] sm:$0xff] (!%p2271_p1), %v406_v1  ;;  %v408_v3 = vld [vmem:[%s2261_s1 + $0x18] sm:$0xff] (!%p2271_p1)  ;;  %v409_v4 = vld [vmem:[%s2261_s1 + $0x20] sm:$0xff] (!%p2271_p1) }
  0x21   : > { %s1430_s18 = sshll.u32 %s1824_s17, 6  ;;  %s391_s21 = scalar_lea.vmem %s2266_s6, %s1824_s17  ;;  %423 = vst [vmem:[%s2269_s9 + $0x10] sm:$0xff] (!%p2271_p1), %v407_v2  ;;  %v410_v5 = vld [vmem:[%s2261_s1 + $0x28] sm:$0xff] (!%p2271_p1)  ;;  %424 = vst [vmem:[%s2269_s9 + $0x18] sm:$0xff] (!%p2271_p1), %v408_v3  ;;  %v411_v6 = vld [vmem:[%s2261_s1 + $0x30] sm:$0xff] (!%p2271_p1) }
  0x22   : > { %s1834_s24 = scalar_lea.vmem %s2264_s4, %s1430_s18  ;;  %s1839_s27 = scalar_lea.vmem %s2265_s5, %s1430_s18  ;;  %425 = vst [vmem:[%s2269_s9 + $0x20] sm:$0xff] (!%p2271_p1), %v409_v4  ;;  %426 = vst [vmem:[%s2269_s9 + $0x28] sm:$0xff] (!%p2271_p1), %v410_v5  ;;  %v412_v7 = vld [vmem:[%s2261_s1 + $0x38] sm:$0xff] (!%p2271_p1)  ;;  %v413_v8 = vld [vmem:[%s2261_s1 + $0x40] sm:$0xff] (!%p2271_p1) }
  0x23   : > { %s1844_s11 = scalar_lea.vmem %s2267_s7, %s1430_s18  ;;  %s399_s14 = scalar_lea.vmem %s2268_s8, %s1824_s17  ;;  %427 = vst [vmem:[%s2269_s9 + $0x30] sm:$0xff] (!%p2271_p1), %v411_v6  ;;  %428 = vst [vmem:[%s2269_s9 + $0x38] sm:$0xff] (!%p2271_p1), %v412_v7  ;;  %v414_v9 = vld [vmem:[%s2261_s1 + $0x48] sm:$0xff] (!%p2271_p1)  ;;  %v415_v10 = vld [vmem:[%s2261_s1 + $0x50] sm:$0xff] (!%p2271_p1) }
  0x24   : > { %429 = vst [vmem:[%s2269_s9 + $0x40] sm:$0xff] (!%p2271_p1), %v413_v8  ;;  %v416_v11 = vld [vmem:[%s2261_s1 + $0x58] sm:$0xff] (!%p2271_p1)  ;;  %430 = vst [vmem:[%s2269_s9 + $0x48] sm:$0xff] (!%p2271_p1), %v414_v9  ;;  %v417_v12 = vld [vmem:[%s2261_s1 + $0x60] sm:$0xff] (!%p2271_p1) }
  0x25   : > { %431 = vst [vmem:[%s2269_s9 + $0x50] sm:$0xff] (!%p2271_p1), %v415_v10  ;;  %432 = vst [vmem:[%s2269_s9 + $0x58] sm:$0xff] (!%p2271_p1), %v416_v11  ;;  %v418_v13 = vld [vmem:[%s2261_s1 + $0x68] sm:$0xff] (!%p2271_p1)  ;;  %v419_v14 = vld [vmem:[%s2261_s1 + $0x70] sm:$0xff] (!%p2271_p1) }
  0x26   : > { %433 = vst [vmem:[%s2269_s9 + $0x60] sm:$0xff] (!%p2271_p1), %v417_v12  ;;  %434 = vst [vmem:[%s2269_s9 + $0x68] sm:$0xff] (!%p2271_p1), %v418_v13  ;;  %v420_v15 = vld [vmem:[%s2261_s1 + $0x78] sm:$0xff] (!%p2271_p1) }
  0x27   : > { %435 = vst [vmem:[%s2269_s9 + $0x70] sm:$0xff] %v419_v14  ;;  %436 = vst [vmem:[%s2269_s9 + $0x78] sm:$0xff] %v420_v15 }
  0x28 PF: > { %v1951_v16 = vld [vmem:[%s2269_s9] sm:$0xff]  ;;  %v1956_v17 = vld [vmem:[%s2269_s9 + $0x8] sm:$0xff]  ;;  %v1685_v42 = vld [vmem:[%s2262_s2 + $0x10] sm:$0xff]   ;;  %p1426_p2 = scmp.eq.s32.totalorder %s1799_s10, 1 }
  0x29   : > { %v1961_v18 = vld [vmem:[%s2269_s9 + $0x10] sm:$0xff]  ;;  %v469_v19 = vpack.c.bf16 %v1956_v17, %v1951_v16  ;;  %v1968_v20 = vld [vmem:[%s2269_s9 + $0x18] sm:$0xff]  ;;  %v1683_v27 = vld [vmem:[%s2262_s2] sm:$0xff]  }
  0x2a   : > { %v470_v21 = vpack.c.bf16 %v1968_v20, %v1961_v18  ;;  %v1975_v22 = vld [vmem:[%s2269_s9 + $0x20] sm:$0xff]  ;;  %v1980_v23 = vld [vmem:[%s2269_s9 + $0x28] sm:$0xff]  ;;  %1552 = vmatprep.mubr.bf16.mxu0 %v1683_v27  ;;  %v1686_v43 = vld [vmem:[%s2262_s2 + $0x18] sm:$0xff]  }
  0x2b   : > { %1536 = vmatprep.subr.bf16.mxu0 %v469_v19  ;;  %v1985_v24 = vld [vmem:[%s2269_s9 + $0x30] sm:$0xff]  ;;  %v471_v25 = vpack.c.bf16 %v1980_v23, %v1975_v22  ;;  %v1992_v26 = vld [vmem:[%s2269_s9 + $0x38] sm:$0xff]  ;;  %v1684_v41 = vld [vmem:[%s2262_s2 + $0x8] sm:$0xff]  }
  0x2c   : > { %1537 = vmatpush3.bf16.msra.mxu0 %v469_v19  ;;  %v472_v28 = vpack.c.bf16 %v1992_v26, %v1985_v24  ;;  %v2002_v29 = vld [vmem:[%s2269_s9 + $0x40] sm:$0xff]  ;;  %v2007_v30 = vld [vmem:[%s2269_s9 + $0x48] sm:$0xff]  ;;  %v1689_v46 = vld [vmem:[%s2262_s2 + $0x30] sm:$0xff]  }
  0x2d   : > { %1538 = vmatprep.subr.bf16.mxu0 %v470_v21  ;;  %v473_v31 = vpack.c.bf16 %v2007_v30, %v2002_v29  ;;  %v2014_v32 = vld [vmem:[%s2269_s9 + $0x50] sm:$0xff]  ;;  %v2019_v33 = vld [vmem:[%s2269_s9 + $0x58] sm:$0xff]  ;;  %v1687_v44 = vld [vmem:[%s2262_s2 + $0x20] sm:$0xff]  }
  0x2e   : > { %v2024_v34 = vld [vmem:[%s2269_s9 + $0x60] sm:$0xff]  ;;  %v2029_v35 = vld [vmem:[%s2269_s9 + $0x68] sm:$0xff]  ;;  %v474_v36 = vpack.c.bf16 %v2019_v33, %v2014_v32  ;;  %v2036_v37 = vld [vmem:[%s2269_s9 + $0x70] sm:$0xff] }
  0x2f   : > { %v2041_v38 = vld [vmem:[%s2269_s9 + $0x78] sm:$0xff]  ;;  %v475_v39 = vpack.c.bf16 %v2029_v35, %v2024_v34  ;;  %v1688_v45 = vld [vmem:[%s2262_s2 + $0x28] sm:$0xff]   ;;  %v1691_v48 = vld [vmem:[%s2263_s3] sm:$0xff]  }
  0x30   : > { %1539 = vmatpush3.bf16.msra.mxu0 %v470_v21  ;;  %v476_v40 = vpack.c.bf16 %v2041_v38, %v2036_v37  ;;  %v1690_v47 = vld [vmem:[%s2262_s2 + $0x38] sm:$0xff]   ;;  %1584 = vmatprep.mubr.bf16.mxu1 %v1691_v48  ;;  %v1699_v49 = vld [vmem:[%s1839_s27] sm:$0xff]   ;;  %v1700_v50 = vld [vmem:[%s1839_s27 + $0x8] sm:$0xff]  }
  0x31   : > { %1540 = vmatprep.subr.bf16.mxu0 %v471_v25  ;;  %v1701_v51 = vld [vmem:[%s1839_s27 + $0x10] sm:$0xff]   ;;  %v1702_v52 = vld [vmem:[%s1839_s27 + $0x18] sm:$0xff]   ;;  %v1703_v53 = vld [vmem:[%s1839_s27 + $0x20] sm:$0xff]  }
  0x32   : > { %v1704_v54 = vld [vmem:[%s1839_s27 + $0x28] sm:$0xff]   ;;  %v1434_v56 = vld [vmem:[%s1834_s24] sm:$0xff]   ;;  %v1467_v2 = vld [vmem:[%s1834_s24 + $0x18] sm:$0xff]  }
  0x33   : > { %v1465_v55 = vld [vmem:[%s1834_s24 + $0x8] sm:$0xff]   ;;  %v1435_v58 = vunpack.c.l.bf16 %v1434_v56  ;;  %v1436_v61 = vunpack.c.h.bf16 %v1434_v56  ;;  %v1466_v5 = vld [vmem:[%s1834_s24 + $0x10] sm:$0xff]   ;;  %v1447_v9 = vunpack.c.l.bf16 %v1467_v2  ;;  %v1448_v14 = vunpack.c.h.bf16 %v1467_v2 }
  0x34   : > { %1541 = vmatpush3.bf16.msra.mxu0 %v471_v25  ;;  %v1439_v57 = vunpack.c.l.bf16 %v1465_v55  ;;  %v1440_v59 = vunpack.c.h.bf16 %v1465_v55  ;;  %v1443_v12 = vunpack.c.l.bf16 %v1466_v5  ;;  %v1444_v21 = vunpack.c.h.bf16 %v1466_v5 }
  0x35   : > { %1542 = vmatprep.subr.bf16.mxu0 %v472_v28 }
  0x38   : > { %1543 = vmatpush3.bf16.msra.mxu0 %v472_v28 }
  0x39   : > { %1544 = vmatprep.subr.bf16.mxu0 %v473_v31 }
  0x3c   : > { %1545 = vmatpush3.bf16.msra.mxu0 %v473_v31 }
  0x3d   : > { %1546 = vmatprep.subr.bf16.mxu0 %v474_v36 }
  0x40   : > { %1547 = vmatpush3.bf16.msra.mxu0 %v474_v36  ;;  %v1469_v36 = vld [vmem:[%s1834_s24 + $0x28] sm:$0xff]  }
  0x41   : > { %1548 = vmatprep.subr.bf16.mxu0 %v475_v39 }
  0x44   : > { %1549 = vmatpush3.bf16.msra.mxu0 %v475_v39 }
  0x45   : > { %1550 = vmatprep.subr.bf16.mxu0 %v476_v40 }
  0x48   : > { %1551 = vmatpush3.bf16.msra.mxu0 %v476_v40 }
  0x49   : > { %1600 = vmatprep.subr.bf16.mxu0 %v1699_v49 }
  0x4b   : > { %1553 = vmatmul.mubr.bf16.vlgmr.msra.gmra.mrb[0].mxu0 %v1684_v41  ;;  %v1468_v41 = vld [vmem:[%s1834_s24 + $0x20] sm:$0xff]  }
  0x4c   : > { %1556 = vmatprep.mubr.bf16.mxu0 %v1685_v42  ;;  %1601 = vmatpush3.bf16.msra.mxu0 %v1699_v49  ;;  %v1451_v48 = vunpack.c.l.bf16 %v1468_v41 }
  0x4d   : > { %1602 = vmatprep.subr.bf16.mxu0 %v1700_v50 }
  0x50   : > { %1603 = vmatpush3.bf16.msra.mxu0 %v1700_v50  ;;  %v1456_v50 = vunpack.c.h.bf16 %v1469_v36 }
  0x51   : > { %1604 = vmatprep.subr.bf16.mxu0 %v1701_v51 }
  0x53   : > { %1557 = vmatmul.mubr.bf16.gmra.mrb[4].mxu0 %v1686_v43 }
  0x54   : > { %1560 = vmatprep.mubr.bf16.mxu0 %v1687_v44  ;;  %1605 = vmatpush3.bf16.msra.mxu0 %v1701_v51 }
  0x55   : > { %1606 = vmatprep.subr.bf16.mxu0 %v1702_v52 }
  0x58   : > { %1607 = vmatpush3.bf16.msra.mxu0 %v1702_v52 }
  0x59   : > { %1608 = vmatprep.subr.bf16.mxu0 %v1703_v53 }
  0x5b   : > { %1561 = vmatmul.mubr.bf16.gmra.mrb[8].mxu0 %v1688_v45  ;;  %v1455_v45 = vunpack.c.l.bf16 %v1469_v36 }
  0x5c   : > { %1564 = vmatprep.mubr.bf16.mxu0 %v1689_v46  ;;  %1609 = vmatpush3.bf16.msra.mxu0 %v1703_v53  ;;  %v1452_v53 = vunpack.c.h.bf16 %v1468_v41  ;;  %v1694_v41 = vld [vmem:[%s2263_s3 + $0x18] sm:$0xff]  }
  0x5d   : > { %1610 = vmatprep.subr.bf16.mxu0 %v1704_v54 }
  0x60   : > { %1611 = vmatpush3.bf16.msra.mxu0 %v1704_v54 }
  0x63   : > { %1565 = vmatmul.mubr.bf16.gmra.mrb[12].mxu0 %v1690_v47 }
 0x11e   : > { %v1554_v60 = vpop.f32.mrb[0].mxu0 }
 0x11f   : > { %v600_v62 = vadd.f32 %v1554_v60, %v1439_v57  ;;  %v591_v63 = vpop.f32.mrb[1].mxu0 }
 0x120   : > { %v592_v0 = vadd.f32 %v1435_v58, %v591_v63  ;;  %v1555_v1 = vpop.f32.mrb[2].mxu0  ;;  %v1471_v58 = vld [vmem:[%s1834_s24 + $0x38] sm:$0xff]  }
 0x121   : > { %v603_v3 = vadd.f32 %v1555_v1, %v1440_v59  ;;  %v594_v4 = vpop.f32.mrb[3].mxu0  ;;  %v656_v7 = vmax.f32 %v600_v62, 0.0  ;;  %v1463_v1 = vunpack.c.l.bf16 %v1471_v58 }
 0x122   : > { %v595_v6 = vadd.f32 %v1436_v61, %v594_v4  ;;  %v654_v10 = vmax.f32 %v592_v0, 0.0  ;;  %v1470_v61 = vld [vmem:[%s1834_s24 + $0x30] sm:$0xff]  }
 0x123   : > { %v657_v8 = vmax.f32 %v603_v3, 0.0  ;;  %v1459_v4 = vunpack.c.l.bf16 %v1470_v61 }
 0x124   : > { %v655_v11 = vmax.f32 %v595_v6, 0.0  ;;  %v1464_v6 = vunpack.c.h.bf16 %v1471_v58 }
 0x125   : > { %v687_v13 = vpack.c.bf16 %v657_v8, %v656_v7 }
 0x126   : > { %v1558_v15 = vpop.f32.mrb[4].mxu0  ;;  %v686_v19 = vpack.c.bf16 %v655_v11, %v654_v10 }
 0x127   : > { %v616_v25 = vadd.f32 %v1558_v15, %v1447_v9  ;;  %v607_v27 = vpop.f32.mrb[5].mxu0  ;;  %v1460_v9 = vunpack.c.h.bf16 %v1470_v61 }
 0x128   : > { %v608_v28 = vadd.f32 %v1443_v12, %v607_v27  ;;  %v1559_v31 = vpop.f32.mrb[6].mxu0  ;;  %1568 = vmatprep.subr.bf16.mxu1 %v686_v19 }
 0x129   : > { %v619_v39 = vadd.f32 %v1559_v31, %v1448_v14  ;;  %v610_v40 = vpop.f32.mrb[7].mxu0  ;;  %1569 = vmatpush3.bf16.msra.mxu1 %v686_v19  ;;  %v660_v43 = vmax.f32 %v616_v25, 0.0 }
 0x12a   : > { %v611_v42 = vadd.f32 %v1444_v21, %v610_v40  ;;  %1570 = vmatprep.subr.bf16.mxu1 %v687_v13  ;;  %v658_v46 = vmax.f32 %v608_v28, 0.0  ;;  %v1693_v40 = vld [vmem:[%s2263_s3 + $0x10] sm:$0xff]  }
 0x12b   : > { %v661_v44 = vmax.f32 %v619_v39, 0.0  ;;  %v1692_v39 = vld [vmem:[%s2263_s3 + $0x8] sm:$0xff]  }
 0x12c   : > { %v659_v47 = vmax.f32 %v611_v42, 0.0  ;;  %v1695_v42 = vld [vmem:[%s2263_s3 + $0x20] sm:$0xff]  }
 0x12d   : > { %v689_v49 = vpack.c.bf16 %v661_v44, %v660_v43  ;;  %1571 = vmatpush3.bf16.msra.mxu1 %v687_v13  ;;  %v1696_v43 = vld [vmem:[%s2263_s3 + $0x28] sm:$0xff]   ;;  %v1697_v44 = vld [vmem:[%s2263_s3 + $0x30] sm:$0xff]  }
 0x12e   : > { %v688_v51 = vpack.c.bf16 %v659_v47, %v658_v46  ;;  %v1562_v52 = vpop.f32.mrb[8].mxu0  ;;  %v1705_v46 = vld [vmem:[%s1839_s27 + $0x30] sm:$0xff]   ;;  %v1706_v47 = vld [vmem:[%s1839_s27 + $0x38] sm:$0xff]   ;;  %s839_s27 = sld [smem:[#allocation2 + %s1799_s10]] }
 0x12f   : > { %v632_v54 = vadd.f32 %v1562_v52, %v1455_v45  ;;  %v623_v55 = vpop.f32.mrb[9].mxu0  ;;  %v1698_v45 = vld [vmem:[%s2263_s3 + $0x38] sm:$0xff]   ;;  %1612 = vmatprep.subr.bf16.mxu0 %v1705_v46  ;;  %v1711_v52 = vld [vmem:[%s1844_s11 + $0x20] sm:$0xff]  }
 0x130   : > { %v624_v56 = vadd.f32 %v1451_v48, %v623_v55  ;;  %v1563_v57 = vpop.f32.mrb[10].mxu0  ;;  %1572 = vmatprep.subr.bf16.mxu1 %v688_v51  ;;  %1613 = vmatpush3.bf16.msra.mxu0 %v1705_v46  ;;  %v1707_v48 = vld [vmem:[%s1844_s11] sm:$0xff]  }
 0x131   : > { %v635_v59 = vadd.f32 %v1563_v57, %v1456_v50  ;;  %v626_v60 = vpop.f32.mrb[11].mxu0  ;;  %1573 = vmatpush3.bf16.msra.mxu1 %v688_v51  ;;  %v664_v63 = vmax.f32 %v632_v54, 0.0  ;;  %1614 = vmatprep.subr.bf16.mxu0 %v1706_v47  ;;  %v1709_v50 = vld [vmem:[%s1844_s11 + $0x10] sm:$0xff]   ;;  %v1710_v51 = vld [vmem:[%s1844_s11 + $0x18] sm:$0xff]  }
 0x132   : > { %v627_v62 = vadd.f32 %v1452_v53, %v626_v60  ;;  %1574 = vmatprep.subr.bf16.mxu1 %v689_v49  ;;  %v662_v2 = vmax.f32 %v624_v56, 0.0  ;;  %v1712_v53 = vld [vmem:[%s1844_s11 + $0x28] sm:$0xff]  }
 0x133   : > { %v665_v0 = vmax.f32 %v635_v59, 0.0 }
 0x134   : > { %v663_v3 = vmax.f32 %v627_v62, 0.0  ;;  %1615 = vmatpush3.bf16.msra.mxu0 %v1706_v47  ;;  %v840_v54 = vstv %s839_s27 }
 0x135   : > { %v691_v5 = vpack.c.bf16 %v665_v0, %v664_v63  ;;  %1575 = vmatpush3.bf16.msra.mxu1 %v689_v49  ;;  %v1708_v49 = vld [vmem:[%s1844_s11 + $0x8] sm:$0xff]   ;;  %v843_v55 = vmul.f32 %v840_v54, %v1961_v18  ;;  %v844_v56 = vmul.f32 %v840_v54, %v1968_v20  ;;  %v841_v58 = vmul.f32 %v840_v54, %v1951_v16 }
 0x136   : > { %v690_v7 = vpack.c.bf16 %v663_v3, %v662_v2  ;;  %v1566_v8 = vpop.f32.mrb[12].mxu0  ;;  %v842_v59 = vmul.f32 %v840_v54, %v1956_v17  ;;  %v848_v18 = vmul.f32 %v840_v54, %v1992_v26  ;;  %v845_v20 = vmul.f32 %v840_v54, %v1975_v22 }
 0x137   : > { %v648_v10 = vadd.f32 %v1566_v8, %v1463_v1  ;;  %v639_v11 = vpop.f32.mrb[13].mxu0  ;;  %v846_v16 = vmul.f32 %v840_v54, %v1980_v23  ;;  %v852_v26 = vmul.f32 %v840_v54, %v2019_v33  ;;  %v849_v22 = vmul.f32 %v840_v54, %v2002_v29 }
 0x138   : > { %v640_v12 = vadd.f32 %v1459_v4, %v639_v11  ;;  %v1567_v13 = vpop.f32.mrb[14].mxu0  ;;  %1576 = vmatprep.subr.bf16.mxu1 %v690_v7  ;;  %v850_v23 = vmul.f32 %v840_v54, %v2007_v30  ;;  %v856_v33 = vmul.f32 %v840_v54, %v2041_v38  ;;  %v853_v29 = vmul.f32 %v840_v54, %v2024_v34  ;;  %v1713_v38 = vld [vmem:[%s1844_s11 + $0x30] sm:$0xff]   ;;  %v1714_v34 = vld [vmem:[%s1844_s11 + $0x38] sm:$0xff]  }
 0x139   : > { %v651_v14 = vadd.f32 %v1567_v13, %v1464_v6  ;;  %v642_v15 = vpop.f32.mrb[15].mxu0  ;;  %1577 = vmatpush3.bf16.msra.mxu1 %v690_v7  ;;  %v668_v21 = vmax.f32 %v648_v10, 0.0  ;;  %v854_v30 = vmul.f32 %v840_v54, %v2029_v35  ;;  %v1408_v35 = vld [vmem:[%s391_s21] ss:$0 sm:$0xff] }
 0x13a   : > { %v643_v19 = vadd.f32 %v1460_v9, %v642_v15  ;;  %1578 = vmatprep.subr.bf16.mxu1 %v691_v5  ;;  %v666_v27 = vmax.f32 %v640_v12, 0.0 }
 0x13b   : > { %v669_v25 = vmax.f32 %v651_v14, 0.0 }
 0x13c   : > { %v667_v28 = vmax.f32 %v643_v19, 0.0 }
 0x13d   : > { %v693_v31 = vpack.c.bf16 %v669_v25, %v668_v21  ;;  %1579 = vmatpush3.bf16.msra.mxu1 %v691_v5  ;;  %v847_v5 = vmul.f32 %v840_v54, %v1985_v24  ;;  %v851_v24 = vmul.f32 %v840_v54, %v2014_v32  ;;  %v855_v32 = vmul.f32 %v840_v54, %v2036_v37 }
 0x13e   : > { %v692_v36 = vpack.c.bf16 %v667_v28, %v666_v27 }
 0x140   : > { %1580 = vmatprep.subr.bf16.mxu1 %v692_v36 }
 0x141   : > { %1581 = vmatpush3.bf16.msra.mxu1 %v692_v36 }
 0x142   : > { %1582 = vmatprep.subr.bf16.mxu1 %v693_v31 }
 0x145   : > { %1583 = vmatpush3.bf16.msra.mxu1 %v693_v31 }
 0x146   : > { %1632 = vmatprep.subr.bf16.mxu1 %v1707_v48 }
 0x148   : > { %1585 = vmatmul.mubr.bf16.vlgmr.msra.gmra.mrb[0].mxu1 %v1692_v39 }
 0x149   : > { %1588 = vmatprep.mubr.bf16.mxu1 %v1693_v40  ;;  %1633 = vmatpush3.bf16.msra.mxu1 %v1707_v48 }
 0x14a   : > { %1634 = vmatprep.subr.bf16.mxu1 %v1708_v49 }
 0x14d   : > { %1635 = vmatpush3.bf16.msra.mxu1 %v1708_v49 }
 0x14e   : > { %1636 = vmatprep.subr.bf16.mxu1 %v1709_v50 }
 0x150   : > { %1589 = vmatmul.mubr.bf16.gmra.mrb[4].mxu1 %v1694_v41 }
 0x151   : > { %1592 = vmatprep.mubr.bf16.mxu1 %v1695_v42  ;;  %1637 = vmatpush3.bf16.msra.mxu1 %v1709_v50 }
 0x152   : > { %1638 = vmatprep.subr.bf16.mxu1 %v1710_v51 }
 0x155   : > { %1639 = vmatpush3.bf16.msra.mxu1 %v1710_v51 }
 0x156   : > { %1640 = vmatprep.subr.bf16.mxu1 %v1711_v52 }
 0x158   : > { %1593 = vmatmul.mubr.bf16.gmra.mrb[8].mxu1 %v1696_v43 }
 0x159   : > { %1596 = vmatprep.mubr.bf16.mxu1 %v1697_v44  ;;  %1641 = vmatpush3.bf16.msra.mxu1 %v1711_v52 }
 0x15a   : > { %1642 = vmatprep.subr.bf16.mxu1 %v1712_v53 }
 0x15d   : > { %1643 = vmatpush3.bf16.msra.mxu1 %v1712_v53 }
 0x15e   : > { %1644 = vmatprep.subr.bf16.mxu1 %v1713_v38 }
 0x160   : > { %1597 = vmatmul.mubr.bf16.gmra.mrb[12].mxu1 %v1698_v45 }
 0x161   : > { %1645 = vmatpush3.bf16.msra.mxu1 %v1713_v38 }
 0x162   : > { %1646 = vmatprep.subr.bf16.mxu1 %v1714_v34 }
 0x165   : > { %1647 = vmatpush3.bf16.msra.mxu1 %v1714_v34 }
 0x21b   : > { %v1586_v57 = vpop.f32.mrb[0].mxu1 }
 0x21c   : > { %v776_v60 = vpop.f32.mrb[1].mxu1  ;;  %v859_v62 = vadd.f32 %v1586_v57, %v843_v55 }
 0x21d   : > { %v1587_v61 = vpop.f32.mrb[2].mxu1  ;;  %v857_v1 = vadd.f32 %v841_v58, %v776_v60 }
 0x21e   : > { %v860_v63 = vadd.f32 %v1587_v61, %v844_v56  ;;  %v779_v0 = vpop.f32.mrb[3].mxu1 }
 0x21f   : > { %v858_v2 = vadd.f32 %v842_v59, %v779_v0 }
 0x220   : > { %v874_v3 = vpack.c.bf16 %v860_v63, %v859_v62 }
 0x221   : > { %v873_v4 = vpack.c.bf16 %v858_v2, %v857_v1 }
 0x223   : > { %v1590_v6 = vpop.f32.mrb[4].mxu1  ;;  %1616 = vmatprep.mubr.bf16.mxu0 %v873_v4 }
 0x224   : > { %v792_v17 = vpop.f32.mrb[5].mxu1  ;;  %1617 = vmatmul.mubr.bf16.vlgmr.msra.gmra.mrb[16].mxu0 %v874_v3  ;;  %v863_v8 = vadd.f32 %v1590_v6, %v847_v5 }
 0x225   : > { %v1591_v7 = vpop.f32.mrb[6].mxu1  ;;  %v861_v11 = vadd.f32 %v845_v20, %v792_v17 }
 0x226   : > { %v864_v9 = vadd.f32 %v1591_v7, %v848_v18  ;;  %v795_v10 = vpop.f32.mrb[7].mxu1 }
 0x227   : > { %v862_v12 = vadd.f32 %v846_v16, %v795_v10 }
 0x228   : > { %v876_v13 = vpack.c.bf16 %v864_v9, %v863_v8 }
 0x229   : > { %v875_v14 = vpack.c.bf16 %v862_v12, %v861_v11 }
 0x22b   : > { %v1594_v15 = vpop.f32.mrb[8].mxu1  ;;  %1620 = vmatprep.mubr.bf16.mxu0 %v875_v14 }
 0x22c   : > { %v808_v19 = vpop.f32.mrb[9].mxu1  ;;  %1621 = vmatmul.mubr.bf16.gmra.mrb[20].mxu0 %v876_v13  ;;  %v867_v25 = vadd.f32 %v1594_v15, %v851_v24 }
 0x22d   : > { %v1595_v21 = vpop.f32.mrb[10].mxu1  ;;  %v865_v31 = vadd.f32 %v849_v22, %v808_v19 }
 0x22e   : > { %v868_v27 = vadd.f32 %v1595_v21, %v852_v26  ;;  %v811_v28 = vpop.f32.mrb[11].mxu1 }
 0x22f   : > { %v866_v36 = vadd.f32 %v850_v23, %v811_v28 }
 0x230   : > { %v878_v39 = vpack.c.bf16 %v868_v27, %v867_v25 }
 0x231   : > { %v877_v40 = vpack.c.bf16 %v866_v36, %v865_v31 }
 0x233   : > { %v1598_v41 = vpop.f32.mrb[12].mxu1  ;;  %1624 = vmatprep.mubr.bf16.mxu0 %v877_v40 }
 0x234   : > { %v824_v42 = vpop.f32.mrb[13].mxu1  ;;  %1625 = vmatmul.mubr.bf16.gmra.mrb[24].mxu0 %v878_v39  ;;  %v871_v44 = vadd.f32 %v1598_v41, %v855_v32 }
 0x235   : > { %v1599_v43 = vpop.f32.mrb[14].mxu1  ;;  %v869_v47 = vadd.f32 %v853_v29, %v824_v42 }
 0x236   : > { %v872_v45 = vadd.f32 %v1599_v43, %v856_v33  ;;  %v827_v46 = vpop.f32.mrb[15].mxu1 }
 0x237   : > { %v870_v48 = vadd.f32 %v854_v30, %v827_v46  ;;  %v1417_v46 = vld [vmem:[%s399_s14] ss:$0 sm:$0xff] }
 0x238   : > { %v880_v37 = vpack.c.bf16 %v872_v45, %v871_v44 }
 0x239   : > { %v879_v49 = vpack.c.bf16 %v870_v48, %v869_v47 }
 0x23b   : > { %1628 = vmatprep.mubr.bf16.mxu0 %v879_v49 }
 0x23c   : > { %1629 = vmatmul.mubr.bf16.gmra.mrb[28].mxu0 %v880_v37 }
 0x2f7   : > { %v1618_v50 = vpop.f32.mrb[16].mxu0 }
 0x2f8   : > { %v995_v51 = vadd.f32 %v1618_v50, %v1408_v35  ;;  %v986_v52 = vpop.f32.mrb[17].mxu0 }
 0x2f9   : > { %v987_v53 = vadd.f32 %v1408_v35, %v986_v52  ;;  %v1619_v54 = vpop.f32.mrb[18].mxu0 }
 0x2fa   : > { %v998_v55 = vadd.f32 %v1619_v54, %v1408_v35  ;;  %v989_v56 = vpop.f32.mrb[19].mxu0  ;;  %v1051_v58 = vmax.f32 %v995_v51, 0.0 }
 0x2fb   : > { %v990_v57 = vadd.f32 %v1408_v35, %v989_v56  ;;  %v1049_v60 = vmax.f32 %v987_v53, 0.0 }
 0x2fc   : > { %v1052_v59 = vmax.f32 %v998_v55, 0.0 }
 0x2fd   : > { %v1050_v61 = vmax.f32 %v990_v57, 0.0 }
 0x2fe   : > { %v1066_v62 = vpack.c.bf16 %v1052_v59, %v1051_v58 }
 0x2ff   : > { %v1065_v63 = vpack.c.bf16 %v1050_v61, %v1049_v60  ;;  %v1622_v0 = vpop.f32.mrb[20].mxu0 }
 0x300   : > { %v1011_v1 = vadd.f32 %v1622_v0, %v1408_v35  ;;  %v1002_v2 = vpop.f32.mrb[21].mxu0 }
 0x301   : > { %v1003_v3 = vadd.f32 %v1408_v35, %v1002_v2  ;;  %v1623_v4 = vpop.f32.mrb[22].mxu0  ;;  %1648 = vmatprep.mubr.bf16.mxu1 %v1065_v63 }
 0x302   : > { %v1014_v5 = vadd.f32 %v1623_v4, %v1408_v35  ;;  %v1005_v18 = vpop.f32.mrb[23].mxu0  ;;  %1649 = vmatmul.mubr.bf16.vlgmr.msra.gmra.mrb[16].mxu1 %v1066_v62  ;;  %v1055_v20 = vmax.f32 %v1011_v1, 0.0 }
 0x303   : > { %v1006_v6 = vadd.f32 %v1408_v35, %v1005_v18  ;;  %v1053_v17 = vmax.f32 %v1003_v3, 0.0 }
 0x304   : > { %v1056_v16 = vmax.f32 %v1014_v5, 0.0 }
 0x305   : > { %v1054_v7 = vmax.f32 %v1006_v6, 0.0 }
 0x306   : > { %v1068_v8 = vpack.c.bf16 %v1056_v16, %v1055_v20 }
 0x307   : > { %v1067_v9 = vpack.c.bf16 %v1054_v7, %v1053_v17  ;;  %v1626_v10 = vpop.f32.mrb[24].mxu0 }
 0x308   : > { %v1027_v11 = vadd.f32 %v1626_v10, %v1408_v35  ;;  %v1018_v12 = vpop.f32.mrb[25].mxu0 }
 0x309   : > { %v1019_v13 = vadd.f32 %v1408_v35, %v1018_v12  ;;  %v1627_v14 = vpop.f32.mrb[26].mxu0  ;;  %1652 = vmatprep.mubr.bf16.mxu1 %v1067_v9 }
 0x30a   : > { %v1030_v24 = vadd.f32 %v1627_v14, %v1408_v35  ;;  %v1021_v26 = vpop.f32.mrb[27].mxu0  ;;  %1653 = vmatmul.mubr.bf16.gmra.mrb[20].mxu1 %v1068_v8  ;;  %v1059_v22 = vmax.f32 %v1027_v11, 0.0 }
 0x30b   : > { %v1022_v15 = vadd.f32 %v1408_v35, %v1021_v26  ;;  %v1057_v19 = vmax.f32 %v1019_v13, 0.0 }
 0x30c   : > { %v1060_v23 = vmax.f32 %v1030_v24, 0.0 }
 0x30d   : > { %v1058_v21 = vmax.f32 %v1022_v15, 0.0 }
 0x30e   : > { %v1070_v25 = vpack.c.bf16 %v1060_v23, %v1059_v22 }
 0x30f   : > { %v1069_v27 = vpack.c.bf16 %v1058_v21, %v1057_v19  ;;  %v1630_v28 = vpop.f32.mrb[28].mxu0 }
 0x310   : > { %v1043_v31 = vadd.f32 %v1630_v28, %v1408_v35  ;;  %v1034_v36 = vpop.f32.mrb[29].mxu0 }
 0x311   : > { %v1035_v39 = vadd.f32 %v1408_v35, %v1034_v36  ;;  %v1631_v40 = vpop.f32.mrb[30].mxu0  ;;  %1656 = vmatprep.mubr.bf16.mxu1 %v1069_v27 }
 0x312   : > { %v1046_v32 = vadd.f32 %v1631_v40, %v1408_v35  ;;  %v1037_v33 = vpop.f32.mrb[31].mxu0  ;;  %1657 = vmatmul.mubr.bf16.gmra.mrb[24].mxu1 %v1070_v25  ;;  %v1063_v29 = vmax.f32 %v1043_v31, 0.0 }
 0x313   : > { %v1038_v41 = vadd.f32 %v1408_v35, %v1037_v33  ;;  %v1061_v42 = vmax.f32 %v1035_v39, 0.0 }
 0x314   : > { %v1064_v30 = vmax.f32 %v1046_v32, 0.0 }
 0x315   : > { %v1062_v43 = vmax.f32 %v1038_v41, 0.0 }
 0x316   : > { %v1072_v44 = vpack.c.bf16 %v1064_v30, %v1063_v29 }
 0x317   : > { %v1071_v45 = vpack.c.bf16 %v1062_v43, %v1061_v42 }
 0x319   : > { %1660 = vmatprep.mubr.bf16.mxu1 %v1071_v45 }
 0x31a   : > { %1661 = vmatmul.mubr.bf16.gmra.mrb[28].mxu1 %v1072_v44 }
 0x3d5   : > { %v1650_v47 = vpop.f32.mrb[16].mxu1 }
 0x3d6   : > { %v2143_v48 = vadd.f32 %v1650_v47, %v1417_v46  ;;  %v1178_v37 = vpop.f32.mrb[17].mxu1 }
 0x3d7   : > { %v2145_v49 = vadd.f32 %v1417_v46, %v1178_v37  ;;  %v1651_v38 = vpop.f32.mrb[18].mxu1 }
 0x3d8   : > { %v2147_v34 = vadd.f32 %v1651_v38, %v1417_v46  ;;  %v1181_v35 = vpop.f32.mrb[19].mxu1  ;;  %v1247_v9 = vmax.f32 (!%p1426_p2), %v2143_v48, 0.0 }
 0x3d9   : > { %v1182_v50 = vadd.f32 %v1417_v46, %v1181_v35  ;;  %v1245_v7 = vmax.f32 (!%p1426_p2), %v2145_v49, 0.0 }
 0x3da   : > { %v1248_v10 = vmax.f32 (!%p1426_p2), %v2147_v34, 0.0  ;;  %1263 = vst [vmem:[%s2269_s9 + $0x10] sm:$0xff] (!%p1426_p2), %v1247_v9 }
 0x3db   : > { %v1246_v8 = vmax.f32 (!%p1426_p2), %v1182_v50, 0.0  ;;  %1261 = vst [vmem:[%s2269_s9] sm:$0xff] (!%p1426_p2), %v1245_v7 }
 0x3dc   : > { %1264 = vst [vmem:[%s2269_s9 + $0x18] sm:$0xff] (!%p1426_p2), %v1248_v10 }
 0x3dd   : > { %v1654_v51 = vpop.f32.mrb[20].mxu1  ;;  %1262 = vst [vmem:[%s2269_s9 + $0x8] sm:$0xff] (!%p1426_p2), %v1246_v8 }
 0x3de   : > { %v2149_v52 = vadd.f32 %v1654_v51, %v1417_v46  ;;  %v1194_v53 = vpop.f32.mrb[21].mxu1 }
 0x3df   : > { %v1195_v54 = vadd.f32 %v1417_v46, %v1194_v53  ;;  %v1655_v55 = vpop.f32.mrb[22].mxu1 }
 0x3e0   : > { %v1206_v56 = vadd.f32 %v1655_v55, %v1417_v46  ;;  %v1197_v57 = vpop.f32.mrb[23].mxu1  ;;  %v1251_v13 = vmax.f32 (!%p1426_p2), %v2149_v52, 0.0 }
 0x3e1   : > { %v1198_v58 = vadd.f32 %v1417_v46, %v1197_v57  ;;  %v1249_v11 = vmax.f32 (!%p1426_p2), %v1195_v54, 0.0 }
 0x3e2   : > { %v1252_v14 = vmax.f32 (!%p1426_p2), %v1206_v56, 0.0  ;;  %1267 = vst [vmem:[%s2269_s9 + $0x30] sm:$0xff] (!%p1426_p2), %v1251_v13 }
 0x3e3   : > { %v1250_v12 = vmax.f32 (!%p1426_p2), %v1198_v58, 0.0  ;;  %1265 = vst [vmem:[%s2269_s9 + $0x20] sm:$0xff] (!%p1426_p2), %v1249_v11 }
 0x3e4   : > { %1268 = vst [vmem:[%s2269_s9 + $0x38] sm:$0xff] (!%p1426_p2), %v1252_v14 }
 0x3e5   : > { %v1658_v59 = vpop.f32.mrb[24].mxu1  ;;  %1266 = vst [vmem:[%s2269_s9 + $0x28] sm:$0xff] (!%p1426_p2), %v1250_v12 }
 0x3e6   : > { %v1219_v60 = vadd.f32 %v1658_v59, %v1417_v46  ;;  %v1210_v61 = vpop.f32.mrb[25].mxu1 }
 0x3e7   : > { %v1211_v62 = vadd.f32 %v1417_v46, %v1210_v61  ;;  %v1659_v63 = vpop.f32.mrb[26].mxu1 }
 0x3e8   : > { %v1222_v0 = vadd.f32 %v1659_v63, %v1417_v46  ;;  %v1213_v1 = vpop.f32.mrb[27].mxu1  ;;  %v1255_v15 = vmax.f32 (!%p1426_p2), %v1219_v60, 0.0 }
 0x3e9   : > { %v1214_v2 = vadd.f32 %v1417_v46, %v1213_v1  ;;  %v1253_v24 = vmax.f32 (!%p1426_p2), %v1211_v62, 0.0 }
 0x3ea   : > { %v1256_v22 = vmax.f32 (!%p1426_p2), %v1222_v0, 0.0  ;;  %1271 = vst [vmem:[%s2269_s9 + $0x50] sm:$0xff] (!%p1426_p2), %v1255_v15 }
 0x3eb   : > { %1244 = sbr.rel (%p1426_p2) target bundleno = 1014 (0x3f6), region = 68  ;;  %v1254_v26 = vmax.f32 (!%p1426_p2), %v1214_v2, 0.0  ;;  %1269 = vst [vmem:[%s2269_s9 + $0x40] sm:$0xff] (!%p1426_p2), %v1253_v24 }
 0x3ec   : > { %1272 = vst [vmem:[%s2269_s9 + $0x58] sm:$0xff] (!%p1426_p2), %v1256_v22 }
 0x3ed   : > { %v1662_v3 = vpop.f32.mrb[28].mxu1  ;;  %1270 = vst [vmem:[%s2269_s9 + $0x48] sm:$0xff] (!%p1426_p2), %v1254_v26 }
 0x3ee   : > { %v1235_v4 = vadd.f32 %v1662_v3, %v1417_v46  ;;  %v1226_v5 = vpop.f32.mrb[29].mxu1 }
 0x3ef   : > { %v1227_v18 = vadd.f32 %v1417_v46, %v1226_v5  ;;  %v1663_v6 = vpop.f32.mrb[30].mxu1 }
 0x3f0   : > { %v1238_v20 = vadd.f32 %v1663_v6, %v1417_v46  ;;  %v1229_v16 = vpop.f32.mrb[31].mxu1  ;;  %v1259_v21 = vmax.f32 (!%p1426_p2), %v1235_v4, 0.0 }
 0x3f1   : > { %v1230_v17 = vadd.f32 %v1417_v46, %v1229_v16  ;;  %v1257_v23 = vmax.f32 (!%p1426_p2), %v1227_v18, 0.0 }
 0x3f2   : > { %v1260_v25 = vmax.f32 %v1238_v20, 0.0  ;;  %1275 = vst [vmem:[%s2269_s9 + $0x70] sm:$0xff] %v1259_v21 }
 0x3f3   : > { %v1258_v19 = vmax.f32 %v1230_v17, 0.0  ;;  %1273 = vst [vmem:[%s2269_s9 + $0x60] sm:$0xff] %v1257_v23 }
 0x3f4   : > { %1276 = vst [vmem:[%s2269_s9 + $0x78] sm:$0xff] %v1260_v25 }
 0x3f5   : > { %1274 = vst [vmem:[%s2269_s9 + $0x68] sm:$0xff] %v1258_v19 }
 0x3f6 PF: > { %p1427_p3 = scmp.ne.s32.totalorder %s1799_s10, 1 }
 0x3f7   : > { %1281 = vst [vmem:[%s2269_s9] sm:$0xff] (!%p1427_p3), %v2145_v49  ;;  %1282 = vst [vmem:[%s2269_s9 + $0x8] sm:$0xff] (!%p1427_p3), %v1182_v50 }
 0x3f8   : > { %1280 = sbr.rel (%p1427_p3) target bundleno = 1023 (0x3ff), region = 72  ;;  %1283 = vst [vmem:[%s2269_s9 + $0x10] sm:$0xff] (!%p1427_p3), %v2143_v48  ;;  %1284 = vst [vmem:[%s2269_s9 + $0x18] sm:$0xff] (!%p1427_p3), %v2147_v34 }
 0x3f9   : > { %1285 = vst [vmem:[%s2269_s9 + $0x20] sm:$0xff] (!%p1427_p3), %v1195_v54  ;;  %1286 = vst [vmem:[%s2269_s9 + $0x28] sm:$0xff] (!%p1427_p3), %v1198_v58 }
 0x3fa   : > { %1287 = vst [vmem:[%s2269_s9 + $0x30] sm:$0xff] (!%p1427_p3), %v2149_v52  ;;  %1288 = vst [vmem:[%s2269_s9 + $0x38] sm:$0xff] (!%p1427_p3), %v1206_v56 }
 0x3fb   : > { %1289 = vst [vmem:[%s2269_s9 + $0x40] sm:$0xff] (!%p1427_p3), %v1211_v62  ;;  %1290 = vst [vmem:[%s2269_s9 + $0x48] sm:$0xff] (!%p1427_p3), %v1214_v2 }
 0x3fc   : > { %1291 = vst [vmem:[%s2269_s9 + $0x50] sm:$0xff] (!%p1427_p3), %v1219_v60  ;;  %1292 = vst [vmem:[%s2269_s9 + $0x58] sm:$0xff] (!%p1427_p3), %v1222_v0 }
 0x3fd   : > { %1293 = vst [vmem:[%s2269_s9 + $0x60] sm:$0xff] (!%p1427_p3), %v1227_v18  ;;  %1294 = vst [vmem:[%s2269_s9 + $0x68] sm:$0xff] (!%p1427_p3), %v1230_v17 }
 0x3fe   : > { %1295 = vst [vmem:[%s2269_s9 + $0x70] sm:$0xff] (!%p1427_p3), %v1235_v4  ;;  %1296 = vst [vmem:[%s2269_s9 + $0x78] sm:$0xff] (!%p1427_p3), %v1238_v20 }
 0x3ff PF: > { %s20_s30 = sadd.s32 1, %s1740_s30  }
 0x400   : > { %p17_p4 = scmp.ge.s32.totalorder %s20_s30, 4  }
 0x402   :  { %19 = sbr.rel (!%p17_p4) target bundleno = 1 (0x1), region = 111 }
 0x409   :  { %1308 = vsyncpa [#allocation3], 1 }
 0x40a   :  { %1310 = vsyncpa [#allocation3 + $0x1], 1 }

</bundles_post_ra>
